<compile_context>
chip_gen: v5e
topology: v5e:2x2
jax: 0.10.0
libtpu: 0.0.40
codegen_flags: <defaults>
</compile_context>

<pallas_src>
import jax
import jax.numpy as jnp
from jax.experimental import pallas as pl
from jax.experimental.pallas import tpu as pltpu

_LANE = 128
_SUB = 8


def _tree_sum(rows):
    """Pairwise (tree) sum of a list of equal-shaped arrays: dep depth ceil(log2 n)."""
    while len(rows) > 1:
        nxt = [rows[i] + rows[i + 1] for i in range(0, len(rows) - 1, 2)]
        if len(rows) % 2:
            nxt.append(rows[-1])
        rows = nxt
    return rows[0]


def net_kernel(idx_ref, emb_ref, params_ref, out_ref, pooled_ref):
    # idx_ref    : (B, S) int32 in SMEM (scalar prefetch) -- addressing data only.
    # emb_ref    : (Vp, Dp) f32 VMEM embedding table (zero-padded).
    # params_ref : (Dp+8, Hp) f32 VMEM packed params slab (w1 | b1(+1-lane) | w2(+b2)).
    # pooled_ref : (8, Dp) f32 VMEM scratch accumulator for the mean-pooled batch.
    B, S = idx_ref.shape
    Dp = emb_ref.shape[1]
    inv_s = 1.0 / S

    # --- Fused embedding gather + mean pool (tree-summed, scratch-accumulated) ---
    # SMEM scalar indices drive dynamic (1, Dp) row loads from the VMEM table; the
    # S rows per batch element are pairwise-summed (depth log2(S)) and written
    # straight to the scratch accumulator row -- no concatenate / vreg shuffle.
    # NOTE: like PyTorch .mean(dim=1), padding tokens are included in the divisor
    # (row 0 of the table is all-zero, padding_idx=0).
    # TODO(synk): if B*S grows beyond ~64 rows, switch this unrolled Python loop to
    # lax.fori_loop(..., unroll=True), or DMA-gather from an HBM-resident table
    # (mandatory on v7x for realistic vocab sizes: only 64 MiB physical VMEM).
    for b in range(B):
        rows = [emb_ref[pl.ds(idx_ref[b, s], 1), :] for s in range(S)]
        pooled_ref[pl.ds(b, 1), :] = _tree_sum(rows) * inv_s

    pooled = pooled_ref[0:B, :]                                  # (B, Dp)

    # --- Unpack the params slab with static (tile-aligned) slices ---------------
    w1 = params_ref[0:Dp, :]                                     # (Dp, Hp)
    b1 = params_ref[Dp:Dp + 1, :]                                # (1, Hp), lane H == 1.0
    w2 = params_ref[Dp + 1:Dp + 2, :]                            # (1, Hp), lane H == b2

    # --- Linear(d, h) + ReLU: single MXU pass, f32 accumulation ------------------
    h = jnp.dot(pooled, w1, preferred_element_type=jnp.float32) + b1  # (B, Hp)
    h = jnp.maximum(h, 0.0)                                      # lane H stays exactly 1.0

    # --- Linear(h, 1) + Sigmoid as VPU multiply + XLU lane reduce ----------------
    # b2 rides in via the constant-1 lane (h[:,H] * w2[:,H] == b2); padded lanes are 0.
    y = jnp.sum(h * w2, axis=-1, keepdims=True)                  # (B, 1)

    # TODO(synk): if fused into a larger pipeline, write a lane-dense (>=128) output
    # slab and slice outside; the (B,1) masked store is fine at 8 bytes of output.
    out_ref[...] = jax.nn.sigmoid(y)


def net_forward(idx, emb, w1, b1, w2, b2):
    """idx (B,S) int32; emb (V,D); w1 (D,H)=linear1.weight.T; b1 (1,H);
    w2 (1,H)=linear2.weight (PyTorch layout); b2 (1,1)."""
    B, S = idx.shape
    V, D = emb.shape
    H = w1.shape[1]

    # Lane-dense padding of the feature dims (zeros are inert through the math).
    Dp = max(_LANE, -(-D // _LANE) * _LANE)
    Hp = max(_LANE, -(-H // _LANE) * _LANE)
    if Hp == H:                      # need one spare hidden lane for the b2 fold
        Hp += _LANE
    Vp = -(-V // _SUB) * _SUB        # sublane-align the table rows

    emb_p = jnp.zeros((Vp, Dp), jnp.float32).at[:V, :D].set(emb.astype(jnp.float32))

    # Packed params slab: rows [0:Dp]=w1, row Dp=b1 (+1.0 lane), row Dp+1=w2 (+b2 lane).
    P = Dp + _SUB
    params = jnp.zeros((P, Hp), jnp.float32)
    params = params.at[:D, :H].set(w1.astype(jnp.float32))
    params = params.at[Dp, :H].set(jnp.reshape(b1, (H,)).astype(jnp.float32))
    params = params.at[Dp, H].set(1.0)                        # constant-1 activation lane
    params = params.at[Dp + 1, :H].set(jnp.reshape(w2, (H,)).astype(jnp.float32))
    params = params.at[Dp + 1, H].set(jnp.reshape(b2, ()).astype(jnp.float32))  # b2 fold

    # Dynamic VMEM row loads have no runtime bounds check: clamp ids defensively.
    idx = jnp.clip(idx.astype(jnp.int32), 0, V - 1)

    grid_spec = pltpu.PrefetchScalarGridSpec(
        num_scalar_prefetch=1,            # idx -> SMEM, drives the in-kernel gather
        grid=(1,),                        # everything VMEM-resident at this size
        in_specs=[
            pl.BlockSpec((Vp, Dp), lambda i, idx_sm: (0, 0)),   # embedding table
            pl.BlockSpec((P, Hp), lambda i, idx_sm: (0, 0)),    # packed params slab
        ],
        out_specs=pl.BlockSpec((B, 1), lambda i, idx_sm: (0, 0)),
        scratch_shapes=[pltpu.VMEM((_SUB, Dp), jnp.float32)],   # pooled accumulator
    )
    # TODO(synk): for B >= ~256, add a leading batch grid axis with
    # dimension_semantics=("parallel", "arbitrary") so v7x shards it across its two
    # TensorCores, and set vmem_limit_bytes explicitly if V or B*S grow.
    return pl.pallas_call(
        net_kernel,
        out_shape=jax.ShapeDtypeStruct((B, 1), jnp.float32),
        grid_spec=grid_spec,
        compiler_params=pltpu.CompilerParams(
            dimension_semantics=("arbitrary",)),
    )(idx, emb_p, params)


def net_reference(idx, emb, w1, b1, w2, b2):
    """Pure-JAX reference mirroring the PyTorch forward."""
    x = emb[idx]                       # (B, S, D)
    x = x.mean(axis=1)                 # (B, D)
    x = jnp.maximum(x @ w1 + b1, 0.0)  # Linear(d,h) + ReLU
    x = x @ w2.T + b2                  # Linear(h,1); w2 is (1,H) PyTorch layout
    return jax.nn.sigmoid(x)


if __name__ == "__main__":
    # Sizes implied by the module: embedding_dim = input_size = d = 50,
    # hidden_size = h = 50, output_size = 1. Small vocab / batch / seq.
    D = 50        # embedding_dim == input_size
    H = 50        # hidden_size
    V = 100       # num_embeddings (len(token2index))
    B, S = 2, 8   # batch, sequence length

    key = jax.random.PRNGKey(0)
    k_idx, k_emb, k_w1, k_b1, k_w2, k_b2 = jax.random.split(key, 6)

    emb = jax.random.normal(k_emb, (V, D), jnp.float32) * 0.1
    emb = emb.at[0].set(0.0)  # padding_idx = 0
    w1 = jax.random.normal(k_w1, (D, H), jnp.float32) * 0.1   # linear1.weight.T
    b1 = jax.random.normal(k_b1, (1, H), jnp.float32) * 0.1
    w2 = jax.random.normal(k_w2, (1, H), jnp.float32) * 0.1   # linear2.weight (PyTorch layout)
    b2 = jax.random.normal(k_b2, (1, 1), jnp.float32) * 0.1

    idx = jax.random.randint(k_idx, (B, S), 0, V, jnp.int32)

    out = net_forward(idx, emb, w1, b1, w2, b2)
    out = jax.block_until_ready(out)

    ref = net_reference(idx, emb, w1, b1, w2, b2)
    assert out.shape == (B, 1)
    assert jnp.allclose(out, ref, atol=1e-5, rtol=1e-5), (out, ref)

    print("KERNEL_OK")
</pallas_src>

<mosaic_0001>
module attributes {stable_mosaic.version = 11 : i64} {
  func.func @net_kernel(%arg0: i32, %arg1: memref<2x8xi32, #tpu.memory_space<smem>>, %arg2: memref<104x128xf32, #tpu.memory_space<vmem>>, %arg3: memref<136x128xf32, #tpu.memory_space<vmem>>, %arg4: memref<2x1xf32, #tpu.memory_space<vmem>>, %arg5: memref<8x128xf32, #tpu.memory_space<vmem>>) attributes {dimension_semantics = [#tpu.dimension_semantics<arbitrary>], iteration_bounds = array<i64: 1>, scalar_prefetch = 1 : i64, scratch_operands = 1 : i64, tpu.core_type = #tpu.core_type<tc>, window_params = [{pipeline_mode = #tpu.pipeline_mode<synchronous>, transform_indices = @transform_0, window_bounds = array<i64: 104, 128>}, {pipeline_mode = #tpu.pipeline_mode<synchronous>, transform_indices = @transform_1, window_bounds = array<i64: 136, 128>}, {pipeline_mode = #tpu.pipeline_mode<synchronous>, transform_indices = @transform_2, window_bounds = array<i64: 2, 1>}]} {
    %c0 = arith.constant 0 : index
    %c0_0 = arith.constant 0 : index
    %0 = memref.load %arg1[%c0, %c0_0] : memref<2x8xi32, #tpu.memory_space<smem>>
    %1 = arith.index_cast %0 : i32 to index
    %c0_1 = arith.constant 0 : index
    %2 = vector.load %arg2[%1, %c0_1] : memref<104x128xf32, #tpu.memory_space<vmem>>, vector<1x128xf32>
    %c0_2 = arith.constant 0 : index
    %c1 = arith.constant 1 : index
    %3 = memref.load %arg1[%c0_2, %c1] : memref<2x8xi32, #tpu.memory_space<smem>>
    %4 = arith.index_cast %3 : i32 to index
    %c0_3 = arith.constant 0 : index
    %5 = vector.load %arg2[%4, %c0_3] : memref<104x128xf32, #tpu.memory_space<vmem>>, vector<1x128xf32>
    %c0_4 = arith.constant 0 : index
    %c2 = arith.constant 2 : index
    %6 = memref.load %arg1[%c0_4, %c2] : memref<2x8xi32, #tpu.memory_space<smem>>
    %7 = arith.index_cast %6 : i32 to index
    %c0_5 = arith.constant 0 : index
    %8 = vector.load %arg2[%7, %c0_5] : memref<104x128xf32, #tpu.memory_space<vmem>>, vector<1x128xf32>
    %c0_6 = arith.constant 0 : index
    %c3 = arith.constant 3 : index
    %9 = memref.load %arg1[%c0_6, %c3] : memref<2x8xi32, #tpu.memory_space<smem>>
    %10 = arith.index_cast %9 : i32 to index
    %c0_7 = arith.constant 0 : index
    %11 = vector.load %arg2[%10, %c0_7] : memref<104x128xf32, #tpu.memory_space<vmem>>, vector<1x128xf32>
    %c0_8 = arith.constant 0 : index
    %c4 = arith.constant 4 : index
    %12 = memref.load %arg1[%c0_8, %c4] : memref<2x8xi32, #tpu.memory_space<smem>>
    %13 = arith.index_cast %12 : i32 to index
    %c0_9 = arith.constant 0 : index
    %14 = vector.load %arg2[%13, %c0_9] : memref<104x128xf32, #tpu.memory_space<vmem>>, vector<1x128xf32>
    %c0_10 = arith.constant 0 : index
    %c5 = arith.constant 5 : index
    %15 = memref.load %arg1[%c0_10, %c5] : memref<2x8xi32, #tpu.memory_space<smem>>
    %16 = arith.index_cast %15 : i32 to index
    %c0_11 = arith.constant 0 : index
    %17 = vector.load %arg2[%16, %c0_11] : memref<104x128xf32, #tpu.memory_space<vmem>>, vector<1x128xf32>
    %c0_12 = arith.constant 0 : index
    %c6 = arith.constant 6 : index
    %18 = memref.load %arg1[%c0_12, %c6] : memref<2x8xi32, #tpu.memory_space<smem>>
    %19 = arith.index_cast %18 : i32 to index
    %c0_13 = arith.constant 0 : index
    %20 = vector.load %arg2[%19, %c0_13] : memref<104x128xf32, #tpu.memory_space<vmem>>, vector<1x128xf32>
    %c0_14 = arith.constant 0 : index
    %c7 = arith.constant 7 : index
    %21 = memref.load %arg1[%c0_14, %c7] : memref<2x8xi32, #tpu.memory_space<smem>>
    %22 = arith.index_cast %21 : i32 to index
    %c0_15 = arith.constant 0 : index
    %23 = vector.load %arg2[%22, %c0_15] : memref<104x128xf32, #tpu.memory_space<vmem>>, vector<1x128xf32>
    %24 = arith.addf %2, %5 : vector<1x128xf32>
    %25 = arith.addf %8, %11 : vector<1x128xf32>
    %26 = arith.addf %14, %17 : vector<1x128xf32>
    %27 = arith.addf %20, %23 : vector<1x128xf32>
    %28 = arith.addf %24, %25 : vector<1x128xf32>
    %29 = arith.addf %26, %27 : vector<1x128xf32>
    %30 = arith.addf %28, %29 : vector<1x128xf32>
    %cst = arith.constant 1.250000e-01 : f32
    %31 = vector.broadcast %cst : f32 to vector<1x128xf32>
    %32 = arith.mulf %30, %31 : vector<1x128xf32>
    %c0_16 = arith.constant 0 : index
    %c0_17 = arith.constant 0 : index
    %33 = vector.load %arg5[%c0_16, %c0_17] : memref<8x128xf32, #tpu.memory_space<vmem>>, vector<1x128xf32>
    tpu.vector_store %arg5[%c0_16, %c0_17], %32 {strides = array<i32>} : memref<8x128xf32, #tpu.memory_space<vmem>>, vector<1x128xf32>,
    %c1_18 = arith.constant 1 : index
    %c0_19 = arith.constant 0 : index
    %34 = memref.load %arg1[%c1_18, %c0_19] : memref<2x8xi32, #tpu.memory_space<smem>>
    %35 = arith.index_cast %34 : i32 to index
    %c0_20 = arith.constant 0 : index
    %36 = vector.load %arg2[%35, %c0_20] : memref<104x128xf32, #tpu.memory_space<vmem>>, vector<1x128xf32>
    %c1_21 = arith.constant 1 : index
    %c1_22 = arith.constant 1 : index
    %37 = memref.load %arg1[%c1_21, %c1_22] : memref<2x8xi32, #tpu.memory_space<smem>>
    %38 = arith.index_cast %37 : i32 to index
    %c0_23 = arith.constant 0 : index
    %39 = vector.load %arg2[%38, %c0_23] : memref<104x128xf32, #tpu.memory_space<vmem>>, vector<1x128xf32>
    %c1_24 = arith.constant 1 : index
    %c2_25 = arith.constant 2 : index
    %40 = memref.load %arg1[%c1_24, %c2_25] : memref<2x8xi32, #tpu.memory_space<smem>>
    %41 = arith.index_cast %40 : i32 to index
    %c0_26 = arith.constant 0 : index
    %42 = vector.load %arg2[%41, %c0_26] : memref<104x128xf32, #tpu.memory_space<vmem>>, vector<1x128xf32>
    %c1_27 = arith.constant 1 : index
    %c3_28 = arith.constant 3 : index
    %43 = memref.load %arg1[%c1_27, %c3_28] : memref<2x8xi32, #tpu.memory_space<smem>>
    %44 = arith.index_cast %43 : i32 to index
    %c0_29 = arith.constant 0 : index
    %45 = vector.load %arg2[%44, %c0_29] : memref<104x128xf32, #tpu.memory_space<vmem>>, vector<1x128xf32>
    %c1_30 = arith.constant 1 : index
    %c4_31 = arith.constant 4 : index
    %46 = memref.load %arg1[%c1_30, %c4_31] : memref<2x8xi32, #tpu.memory_space<smem>>
    %47 = arith.index_cast %46 : i32 to index
    %c0_32 = arith.constant 0 : index
    %48 = vector.load %arg2[%47, %c0_32] : memref<104x128xf32, #tpu.memory_space<vmem>>, vector<1x128xf32>
    %c1_33 = arith.constant 1 : index
    %c5_34 = arith.constant 5 : index
    %49 = memref.load %arg1[%c1_33, %c5_34] : memref<2x8xi32, #tpu.memory_space<smem>>
    %50 = arith.index_cast %49 : i32 to index
    %c0_35 = arith.constant 0 : index
    %51 = vector.load %arg2[%50, %c0_35] : memref<104x128xf32, #tpu.memory_space<vmem>>, vector<1x128xf32>
    %c1_36 = arith.constant 1 : index
    %c6_37 = arith.constant 6 : index
    %52 = memref.load %arg1[%c1_36, %c6_37] : memref<2x8xi32, #tpu.memory_space<smem>>
    %53 = arith.index_cast %52 : i32 to index
    %c0_38 = arith.constant 0 : index
    %54 = vector.load %arg2[%53, %c0_38] : memref<104x128xf32, #tpu.memory_space<vmem>>, vector<1x128xf32>
    %c1_39 = arith.constant 1 : index
    %c7_40 = arith.constant 7 : index
    %55 = memref.load %arg1[%c1_39, %c7_40] : memref<2x8xi32, #tpu.memory_space<smem>>
    %56 = arith.index_cast %55 : i32 to index
    %c0_41 = arith.constant 0 : index
    %57 = vector.load %arg2[%56, %c0_41] : memref<104x128xf32, #tpu.memory_space<vmem>>, vector<1x128xf32>
    %58 = arith.addf %36, %39 : vector<1x128xf32>
    %59 = arith.addf %42, %45 : vector<1x128xf32>
    %60 = arith.addf %48, %51 : vector<1x128xf32>
    %61 = arith.addf %54, %57 : vector<1x128xf32>
    %62 = arith.addf %58, %59 : vector<1x128xf32>
    %63 = arith.addf %60, %61 : vector<1x128xf32>
    %64 = arith.addf %62, %63 : vector<1x128xf32>
    %cst_42 = arith.constant 1.250000e-01 : f32
    %65 = vector.broadcast %cst_42 : f32 to vector<1x128xf32>
    %66 = arith.mulf %64, %65 : vector<1x128xf32>
    %c1_43 = arith.constant 1 : index
    %c0_44 = arith.constant 0 : index
    %67 = vector.load %arg5[%c1_43, %c0_44] : memref<8x128xf32, #tpu.memory_space<vmem>>, vector<1x128xf32>
    tpu.vector_store %arg5[%c1_43, %c0_44], %66 {strides = array<i32>} : memref<8x128xf32, #tpu.memory_space<vmem>>, vector<1x128xf32>,
    %c0_45 = arith.constant 0 : index
    %c0_46 = arith.constant 0 : index
    %68 = vector.load %arg5[%c0_45, %c0_46] : memref<8x128xf32, #tpu.memory_space<vmem>>, vector<2x128xf32>
    %c0_47 = arith.constant 0 : index
    %c0_48 = arith.constant 0 : index
    %69 = vector.load %arg3[%c0_47, %c0_48] : memref<136x128xf32, #tpu.memory_space<vmem>>, vector<128x128xf32>
    %c128 = arith.constant 128 : index
    %c0_49 = arith.constant 0 : index
    %70 = vector.load %arg3[%c128, %c0_49] : memref<136x128xf32, #tpu.memory_space<vmem>>, vector<1x128xf32>
    %c129 = arith.constant 129 : index
    %c0_50 = arith.constant 0 : index
    %71 = vector.load %arg3[%c129, %c0_50] : memref<136x128xf32, #tpu.memory_space<vmem>>, vector<1x128xf32>
    %cst_51 = arith.constant dense<0.000000e+00> : vector<2x128xf32>
    %72 = tpu.matmul %68, %69, %cst_51 {dimension_numbers = #tpu.dot_dimension_numbers<[1], [0], [0], [1], [0, 0, 1, 1], [], []>} : vector<2x128xf32>, vector<128x128xf32>, vector<2x128xf32> -> vector<2x128xf32>
    %73 = vector.broadcast %70 : vector<1x128xf32> to vector<2x128xf32>
    %74 = arith.addf %72, %73 : vector<2x128xf32>
    %cst_52 = arith.constant 0.000000e+00 : f32
    %75 = vector.broadcast %cst_52 : f32 to vector<2x128xf32>
    %76 = arith.maximumf %74, %75 : vector<2x128xf32>
    %77 = vector.broadcast %71 : vector<1x128xf32> to vector<2x128xf32>
    %78 = arith.mulf %76, %77 : vector<2x128xf32>
    %cst_53 = arith.constant dense<0.000000e+00> : vector<2xf32>
    %79 = vector.multi_reduction <add>, %78, %cst_53 [1] : vector<2x128xf32> to vector<2xf32>
    %80 = vector.shape_cast %79 : vector<2xf32> to vector<2x1xf32>
    %81 = arith.negf %80 : vector<2x1xf32>
    %82 = math.exp %81 : vector<2x1xf32>
    %cst_54 = arith.constant 1.000000e+00 : f32
    %83 = vector.broadcast %cst_54 : f32 to vector<2x1xf32>
    %84 = arith.addf %83, %82 : vector<2x1xf32>
    %85 = arith.divf %83, %84 : vector<2x1xf32>
    %c0_55 = arith.constant 0 : index
    %c0_56 = arith.constant 0 : index
    %86 = vector.load %arg4[%c0_55, %c0_56] : memref<2x1xf32, #tpu.memory_space<vmem>>, vector<2x1xf32>
    tpu.vector_store %arg4[%c0_55, %c0_56], %85 {strides = array<i32>} : memref<2x1xf32, #tpu.memory_space<vmem>>, vector<2x1xf32>,
    return
  }
  func.func @transform_0(%arg0: i32, %arg1: memref<2x8xi32, #tpu.memory_space<smem>>) -> (i32, i32) {
    %c0_i32 = arith.constant 0 : i32
    %c0_i32_0 = arith.constant 0 : i32
    %c0_i32_1 = arith.constant 0 : i32
    return %c0_i32, %c0_i32_0 : i32, i32
  }
  func.func @transform_1(%arg0: i32, %arg1: memref<2x8xi32, #tpu.memory_space<smem>>) -> (i32, i32) {
    %c0_i32 = arith.constant 0 : i32
    %c0_i32_0 = arith.constant 0 : i32
    %c0_i32_1 = arith.constant 0 : i32
    return %c0_i32, %c0_i32_0 : i32, i32
  }
  func.func @transform_2(%arg0: i32, %arg1: memref<2x8xi32, #tpu.memory_space<smem>>) -> (i32, i32) {
    %c0_i32 = arith.constant 0 : i32
    %c0_i32_0 = arith.constant 0 : i32
    %c0_i32_1 = arith.constant 0 : i32
    return %c0_i32, %c0_i32_0 : i32, i32
  }
}

</mosaic_0001>

<bundles_post_ra>
// kernel: tpu_custom_call.1
= control target key start
LH: loop header
LB: loop body
LE: loop exit
PB: predicated region body
PF: predicated region fallthrough
CT: control target
= control target key end

     0   :  { %s301_s15 = smov [#allocation4]   ;;  %s347_s0 = inlined_call_operand.hbm [shape: s32[2,8], index: 0, kind: input, shape index: {}]   ;;  %s348_s1 = inlined_call_operand.hbm [shape: f32[104,128], index: 1, kind: input, shape index: {}]   ;;  %s349_s2 = inlined_call_operand.hbm [shape: f32[136,128], index: 2, kind: input, shape index: {}]   ;;  %s350_s3 = inlined_call_operand.vmem [shape: f32[2,1], index: 3, kind: output, shape index: {}]  }
   0x1   :  { %s9_s14 = sshll.u32 %s347_s0, 4  ;;  %s10_s14 = int_to_ptr.hbm [resolvable:$true] %s9_s14 }
   0x2   :  { %12 = dma.hbm_to_smem %s10_s14, 32, %s301_s15, [#allocation3] }
   0x3   :  { %295 = dma.done.wait [#allocation3], 32 }
   0x4   :  { %296 = vsyncadd [#allocation3], 4294967264 }
   0x5   :  { %15 = sfence }
   0x6   :  { %16 = vsyncpa [#allocation6], 0  ;;  %s22_s18 = sshll.u32 %s348_s1, 4  ;;  %s23_s18 = int_to_ptr.hbm [resolvable:$true] %s22_s18 }
   0x7   :  { %17 = vsyncpa [#allocation8], 0  ;;  %s302_s19 = smov [#allocation5]   ;;  %s35_s0 = sshll.u32 %s349_s2, 4  ;;  %s36_s0 = int_to_ptr.hbm [resolvable:$true] %s35_s0 }
   0x8   :  { %s24_s20 = sshll.u32 %s302_s19, 4  ;;  %s303_s23 = smov 128   ;;  %s25_s20 = int_to_ptr.vmem [resolvable:$true] %s24_s20 }
   0x9   :  { %s304_s24 = smov 8   ;;  %s305_s25 = smov [#allocation7]  }
   0xa   :  { %30 = dma.hbm_to_vmem [thread:$0]  %s23_s18, 1664, %s25_s20, [#allocation6], %s303_s23, %s303_s23, %s304_s24  }
   0xb   :  { %s37_s26 = sshll.u32 %s305_s25, 4  ;;  %s38_s26 = int_to_ptr.vmem [resolvable:$true] %s37_s26 }
   0xc   :  { %43 = dma.hbm_to_vmem [thread:$0]  %s36_s0, 2176, %s38_s26, [#allocation8], %s303_s23, %s303_s23, %s304_s24  }
   0xd   :  { %297 = dma.done.wait [#allocation6], 1664  }
   0xe   :  { %298 = vsyncadd [#allocation6], 4294965632 }
   0xf   :  { %299 = dma.done.wait [#allocation8], 2176  }
  0x10   :  { %300 = vsyncadd [#allocation8], 4294965120  ;;  %s52_s1 = sld [smem:[#allocation4]]  ;;  %v134_v0 = vld [vmem:[#allocation7 + $0x78] sm:$0xff]  ;;  %v133_v1 = vld [vmem:[#allocation7 + $0x70] sm:$0xff]  ;;  %vm161_vm0 = vcmask 1041408  }
  0x11   :  { %s208_s27 = sld [smem:[#allocation4 + $0x1]]  ;;  %138 = vmatpush.msra.mxu0 %v134_v0  ;;  %v132_v2 = vld [vmem:[#allocation7 + $0x68] sm:$0xff]  ;;  %v131_v3 = vld [vmem:[#allocation7 + $0x60] sm:$0xff]  ;;  %v130_v4 = vld [vmem:[#allocation7 + $0x58] sm:$0xff]  ;;  %vm184_vm4 = vcmask 1024  }
  0x12   :  { %s209_s28 = sld [smem:[#allocation4 + $0x2]]  ;;  %v129_v13 = vld [vmem:[#allocation7 + $0x50] sm:$0xff]  ;;  %v128_v19 = vld [vmem:[#allocation7 + $0x48] sm:$0xff]  ;;  %v127_v21 = vld [vmem:[#allocation7 + $0x40] sm:$0xff] }
  0x13   :  { %s210_s29 = sld [smem:[#allocation4 + $0x3]]  ;;  %139 = vmatpush.msra.mxu0 %v133_v1  ;;  %v126_v22 = vld [vmem:[#allocation7 + $0x38] sm:$0xff]  ;;  %v125_v28 = vld [vmem:[#allocation7 + $0x30] sm:$0xff]  ;;  %v124_v33 = vld [vmem:[#allocation7 + $0x28] sm:$0xff] }
  0x14   :  { %s211_s30 = sld [smem:[#allocation4 + $0x4]]  ;;  %v123_v37 = vld [vmem:[#allocation7 + $0x20] sm:$0xff]  ;;  %v122_v41 = vld [vmem:[#allocation7 + $0x18] sm:$0xff]  ;;  %v121_v43 = vld [vmem:[#allocation7 + $0x10] sm:$0xff] }
  0x15   :  { %s212_s4 = sld [smem:[#allocation4 + $0x5]]  ;;  %140 = vmatpush.msra.mxu0 %v132_v2  ;;  %v120_v45 = vld [vmem:[#allocation7 + $0x8] sm:$0xff]  ;;  %v119_v47 = vld [vmem:[#allocation7] sm:$0xff] }
  0x16   :  { %s213_s2 = sld [smem:[#allocation4 + $0x6]]  ;;  %s53_s9 = scalar_lea.vmem [#allocation5], %s52_s1  ;;  %v229_v49 = vld [vmem:[#allocation7 + $0x80] ss:$0 sm:$0xff]  ;;  %v230_v52 = vld [vmem:[#allocation7 + $0x81] ss:$0 sm:$0xff] }
  0x17   :  { %s214_s5 = sld [smem:[#allocation4 + $0x7]]  ;;  %v54_v5 = vld [vmem:[%s53_s9] sm:$0x1]  ;;  %s56_s10 = scalar_lea.vmem [#allocation5], %s208_s27  ;;  %141 = vmatpush.msra.mxu0 %v131_v3 }
  0x18   :  { %s335_s6 = sld [smem:[#allocation4 + $0x80]]  ;;  %v57_v6 = vld [vmem:[%s56_s10] sm:$0x1]  ;;  %s59_s11 = scalar_lea.vmem [#allocation5], %s209_s28 }
  0x19   :  { %s337_s7 = sld [smem:[#allocation4 + $0x81]]  ;;  %v60_v7 = vld [vmem:[%s59_s11] sm:$0x1]  ;;  %s62_s12 = scalar_lea.vmem [#allocation5], %s210_s29  ;;  %v76_v10 = vadd.f32 %v57_v6, %v54_v5  ;;  %142 = vmatpush.msra.mxu0 %v130_v4 }
  0x1a   :  { %s339_s8 = sld [smem:[#allocation4 + $0x82]]  ;;  %v63_v8 = vld [vmem:[%s62_s12] sm:$0x1]  ;;  %s65_s13 = scalar_lea.vmem [#allocation5], %s211_s30 }
  0x1b   :  { %v66_v9 = vld [vmem:[%s65_s13] sm:$0x1]  ;;  %s68_s14 = scalar_lea.vmem [#allocation5], %s212_s4  ;;  %v77_v12 = vadd.f32 %v63_v8, %v60_v7  ;;  %s218_s17 = sld [smem:[#allocation4 + $0x83]]  ;;  %143 = vmatpush.msra.mxu0 %v129_v13 }
  0x1c   :  { %v69_v11 = vld [vmem:[%s68_s14] sm:$0x1]  ;;  %s71_s15 = scalar_lea.vmem [#allocation5], %s213_s2  ;;  %s219_s18 = sld [smem:[#allocation4 + $0x84]] }
  0x1d   :  { %v72_v14 = vld [vmem:[%s71_s15] sm:$0x1]  ;;  %s74_s16 = scalar_lea.vmem [#allocation5], %s214_s5  ;;  %v78_v16 = vadd.f32 %v69_v11, %v66_v9  ;;  %v80_v18 = vadd.f32 %v77_v12, %v76_v10  ;;  %s220_s19 = sld [smem:[#allocation4 + $0x85]]  ;;  %144 = vmatpush.msra.mxu0 %v128_v19 }
  0x1e   :  { %v75_v15 = vld [vmem:[%s74_s16] sm:$0x1]  ;;  %s221_s20 = sld [smem:[#allocation4 + $0x86]]  ;;  %s86_s22 = scalar_lea.vmem [#allocation5], %s335_s6 }
  0x1f   :  { %v79_v17 = vadd.f32 %v75_v15, %v72_v14  ;;  %s222_s21 = sld [smem:[#allocation4 + $0x87]]  ;;  %v87_v24 = vld [vmem:[%s86_s22] sm:$0x1]  ;;  %s89_s0 = scalar_lea.vmem [#allocation5], %s337_s7  ;;  %145 = vmatpush.msra.mxu0 %v127_v21 }
  0x20   :  { %v90_v25 = vld [vmem:[%s89_s0] sm:$0x1]  ;;  %s92_s23 = scalar_lea.vmem [#allocation5], %s339_s8 }
  0x21   :  { %v81_v20 = vadd.f32 %v79_v17, %v78_v16  ;;  %v93_v26 = vld [vmem:[%s92_s23] sm:$0x1]  ;;  %s95_s24 = scalar_lea.vmem [#allocation5], %s218_s17  ;;  %146 = vmatpush.msra.mxu0 %v126_v22  ;;  %v109_v31 = vadd.f32 %v90_v25, %v87_v24 }
  0x22   :  { %v96_v29 = vld [vmem:[%s95_s24] sm:$0x1]  ;;  %s98_s25 = scalar_lea.vmem [#allocation5], %s219_s18 }
  0x23   :  { %v82_v23 = vadd.f32 %v81_v20, %v80_v18  ;;  %v99_v30 = vld [vmem:[%s98_s25] sm:$0x1]  ;;  %v110_v32 = vadd.f32 %v96_v29, %v93_v26  ;;  %s101_s26 = scalar_lea.vmem [#allocation5], %s220_s19  ;;  %147 = vmatpush.msra.mxu0 %v125_v28 }
  0x24   :  { %v102_v34 = vld [vmem:[%s101_s26] sm:$0x1]  ;;  %s104_s1 = scalar_lea.vmem [#allocation5], %s221_s20 }
  0x25   :  { %v83_v27 = vmul.f32 0.125, %v82_v23  ;;  %v105_v35 = vld [vmem:[%s104_s1] sm:$0x1]  ;;  %v111_v36 = vadd.f32 %v102_v34, %v99_v30  ;;  %s107_s27 = scalar_lea.vmem [#allocation5], %s222_s21  ;;  %148 = vmatpush.msra.mxu0 %v124_v33  ;;  %v113_v40 = vadd.f32 %v110_v32, %v109_v31 }
  0x26   :  { %v108_v38 = vld [vmem:[%s107_s27] sm:$0x1] }
  0x27   :  { %84 = vst [vmem:[#allocation2] sm:$0x1] %v83_v27  ;;  %v112_v39 = vadd.f32 %v108_v38, %v105_v35  ;;  %149 = vmatpush.msra.mxu0 %v123_v37 }
  0x29   :  { %v114_v42 = vadd.f32 %v112_v39, %v111_v36  ;;  %150 = vmatpush.msra.mxu0 %v122_v41 }
  0x2b   :  { %v115_v44 = vadd.f32 %v114_v42, %v113_v40  ;;  %151 = vmatpush.msra.mxu0 %v121_v43 }
  0x2d   :  { %v116_v46 = vmul.f32 0.125, %v115_v44  ;;  %152 = vmatpush.msra.mxu0 %v120_v45 }
  0x2f   :  { %117 = vst [vmem:[#allocation2 + $0x1] sm:$0x1] %v116_v46  ;;  %153 = vmatpush.msra.mxu0 %v119_v47 }
  0x36   :  { %v118_v48 = vld [vmem:[#allocation2] sm:$0x3] }
  0x37   :  { %154 = vmatmul.f32.vlgmr.msra.gmra.mxu0 %v118_v48 }
  0xb4   :  { %v155_v50 = vpop.f32.mrf.mxu0 }
  0xb5   :  { %v156_v51 = vadd.f32 %v229_v49, %v155_v50 }
  0xb7   :  { %v158_v53 = vmax.f32 %v156_v51, 0.0 }
  0xb9   :  { %v160_v54 = vmul.f32 %v230_v52, %v158_v53 }
  0xbb   :  { %v162_v55 = vsel %vm161_vm0, %v160_v54, 0.0 }
  0xbc   :  { %163 = vadd.xlane.f32.xlu0 %v162_v55 }
 0x12f   :  { %v164_v56 = vpop.xlane.xlu0 %163 }
 0x130   :  { %v223_v57 = vmul.f32 -1.442695, %v164_v56 }
 0x132   :  { %231 = vpow2.f32 %v223_v57 }
 0x138   :  { %v232_v58 = vpop.eup %231 }
 0x139   :  { %v168_v59 = vadd.f32 1.0, %v232_v58 }
 0x13b   :  { %233 = vrcp.f32 %v168_v59  ;;  %v180_v63 = vand.u32 2147483648, %v168_v59  ;;  %v178_v1 = vand.u32 2147483647, %v168_v59  ;;  %vm174_vm2 = vweird.f32 %v168_v59 }
 0x13d   :  { %v181_v3 = vor.u32 1.1754944e-38, %v180_v63  ;;  %vm179_vm5 = vcmp.eq.f32.partialorder %v178_v1, 8.507059e+37 }
 0x141   :  { %v234_v60 = vpop.eup %233 }
 0x142   :  { %v170_v61 = vmul.f32 %v234_v60, %v168_v59  ;;  %vm175_vm1 = vweird.f32 %v234_v60 }
 0x143   :  { %vm176_vm3 = vmor %vm174_vm2, %vm175_vm1 }
 0x144   :  { %v171_v62 = vsub.f32 1.0, %v170_v61 }
 0x146   :  { %v172_v0 = vmul.f32 %v234_v60, %v171_v62 }
 0x148   :  { %v173_v2 = vadd.f32 %v234_v60, %v172_v0 }
 0x14a   :  { %v177_v4 = vsel %vm176_vm3, %v234_v60, %v173_v2 }
 0x14b   :  { %v182_v5 = vsel %vm179_vm5, %v181_v3, %v177_v4 }
 0x14c   :  { %185 = vst.msk [vmem:[%s350_s3] sm:$0x3] %vm184_vm4, %v182_v5 }
 0x14d   :  { %190 = vsyncpa [#allocation6], 1 }
 0x14e   :  { %191 = vsyncpa [#allocation8], 1 }

</bundles_post_ra>
